<compile_context>
chip_gen: v6e
topology: v6e:2x2x1
jax: 0.10.0
libtpu: 0.0.40
codegen_flags: <defaults>
</compile_context>

<pallas_src>
import functools

import jax
import jax.numpy as jnp
from jax import lax
from jax.experimental import pallas as pl
from jax.experimental.pallas import tpu as pltpu


def _conv_embed_kernel(xsh_ref, w_ref, out_ref, *, K, OH, OW, POH, POW, OC, WPIC):
    # xsh_ref: (Bt, 2, HP2, WP*IC) bf16  H-parity space-to-depth of the padded input
    # w_ref  : (K, WP*IC, OW*OC)   bf16  zero-padded weight, columns = (ow, oc)
    # out_ref: (Bt, POH, POW*OC)         pooled output, lanes = (pw, oc)
    Bt = xsh_ref.shape[0]
    M = Bt * OH

    # ---- 7x7 / stride-2 conv: K matmuls; the W-direction patch gather is folded
    #      into the zero-padded weight (no im2col slab, no narrow masked stores) ----
    acc = jnp.zeros((M, OW * OC), jnp.float32)
    for kh in range(K):
        ph, kh2 = kh % 2, kh // 2
        lhs = xsh_ref[:, ph, kh2:kh2 + OH, :].reshape(M, WPIC)       # (M, WP*IC)
        acc += jnp.dot(lhs, w_ref[kh], preferred_element_type=jnp.float32)
    relu = jnp.maximum(acc, 0.0)                    # (M, OW*OC), rows = (b, oh)

    # ---- MaxPool2d(kernel=3, stride=2, padding=1) -------------------------------
    # Zero padding stands in for -inf padding because values are post-ReLU (>= 0)
    # and every 3x3 window with pad=1 contains at least one real element.
    # W direction: lanes are OC-wide (ow) blocks -> shifted-lane max + even blocks.
    zpad = jnp.zeros((M, OC), jnp.float32)
    left = jnp.concatenate([zpad, relu[:, :-OC]], axis=-1)           # block ow-1
    right = jnp.concatenate([relu[:, OC:], zpad], axis=-1)           # block ow+1
    b3 = jnp.maximum(jnp.maximum(relu, left), right)                 # window @ ow
    wpool = jnp.concatenate(
        [b3[:, (2 * j) * OC:(2 * j + 1) * OC] for j in range(POW)],
        axis=-1)                                                     # (M, POW*OC)

    # H direction: rows are (b, oh) -> parity split, contiguous slices only.
    wp = wpool.reshape(Bt, POH, 2, POW * OC)
    ev, od = wp[:, :, 0, :], wp[:, :, 1, :]                          # rows 2p / 2p+1
    od_up = jnp.concatenate(
        [jnp.zeros((Bt, 1, POW * OC), jnp.float32), od[:, :POH - 1, :]],
        axis=1)                                                      # row 2p-1
    pooled = jnp.maximum(jnp.maximum(ev, od), od_up)                 # (Bt, POH, POW*OC)

    out_ref[...] = pooled.astype(out_ref.dtype)


def conv_embed_forward(x_nchw, rep_weight, convmap_w, *, stride=2, padding=3,
                       pool_k=3, pool_s=2, pool_p=1, out_dtype=jnp.float32):
    B, IC, H, W = x_nchw.shape
    OC, _, K, _ = rep_weight.shape
    map_k = convmap_w.shape[-1]

    # --- RepConv re-parameterization (tiny parameter-space depthwise conv, plain JAX) ---
    origin = rep_weight.reshape(1, OC * IC, K, K)
    mapped = lax.conv_general_dilated(
        origin, convmap_w, window_strides=(1, 1),
        padding=((map_k // 2, map_k // 2), (map_k // 2, map_k // 2)),
        dimension_numbers=('NCHW', 'OIHW', 'NCHW'),
        feature_group_count=OC * IC)
    kernel_eff = rep_weight + mapped.reshape(OC, IC, K, K)

    OH = (H + 2 * padding - K) // stride + 1
    OW = (W + 2 * padding - K) // stride + 1
    POH = (OH + 2 * pool_p - pool_k) // pool_s + 1
    POW = (OW + 2 * pool_p - pool_k) // pool_s + 1
    # Only the default stride-2 conv / (3,2,1) pool with even conv output is supported
    # by the fused shifted-lane / parity pooling path (zero-pad == -inf pad only because
    # values are post-ReLU and every pooling window holds at least one real element).
    assert stride == 2 and pool_k == 3 and pool_s == 2 and pool_p == 1
    assert OH % 2 == 0 and OW % 2 == 0 and POH == OH // 2 and POW == OW // 2

    HP, WP = H + 2 * padding, W + 2 * padding
    assert HP % 2 == 0
    HP2 = HP // 2
    assert (K - 1) // 2 + OH <= HP2
    assert 2 * OW + K <= WP + 2
    WPIC, OWOC, POWOC = WP * IC, OW * OC, POW * OC

    # --- H-parity space-to-depth; (w, ic) folded onto the lane axis (bf16 operand) ---
    x_nhwc = jnp.transpose(x_nchw, (0, 2, 3, 1))
    xp = jnp.pad(x_nhwc, ((0, 0), (padding, padding), (padding, padding), (0, 0)))
    xsh = xp.reshape(B, HP2, 2, WP, IC).transpose(0, 2, 1, 3, 4)
    xsh = xsh.reshape(B, 2, HP2, WPIC).astype(jnp.bfloat16)

    # --- zero-padded weight with the W-direction patch gather folded in:
    #     w2[kh, w*IC+ic, ow*OC+oc] = kernel_eff[oc, ic, kh, w - 2*ow]  (else 0) ---
    w_khkwio = jnp.transpose(kernel_eff, (2, 3, 1, 0))               # (K, K, IC, OC)
    w2 = jnp.zeros((K, WP, IC, OW, OC), jnp.float32)
    for ow in range(OW):                                             # trace-time loop
        w2 = w2.at[:, 2 * ow:2 * ow + K, :, ow, :].set(w_khkwio)
    w2 = w2.reshape(K, WPIC, OWOC).astype(jnp.bfloat16)
    # TODO(synk): for large images (e.g. 224x224) add OW- and OH-block grid axes; the
    # per-OW-block weight (K, (2*OWblk+K-2)*IC, OWblk*OC) is shift-invariant across
    # blocks, and row blocking bounds VMEM on v7x (64 MiB) while feeding both cores.

    # --- batch block: largest matmul M = Bt*OH <= 256 rows (keeps acc/pool live
    #     values ~<= 256 KiB f32, no heavy vreg spill) that still leaves >= 2 grid
    #     steps when B >= 2 (feed both v7x TensorCores). ---
    divs = [d for d in range(1, B + 1) if B % d == 0 and d * OH <= 256]
    if not divs:
        divs = [1]
    multi = [d for d in divs if B // d >= 2]
    Bt = max(multi) if multi else max(divs)

    kernel_fn = functools.partial(
        _conv_embed_kernel, K=K, OH=OH, OW=OW, POH=POH, POW=POW, OC=OC, WPIC=WPIC)

    # --- VMEM budget from actual (tile-padded) buffer sizes, x2 double buffering ---
    def _pad(n, m):
        return ((n + m - 1) // m) * m
    in_bytes = Bt * 2 * _pad(HP2, 16) * _pad(WPIC, 128) * 2
    w_bytes = K * _pad(WPIC, 16) * _pad(OWOC, 128) * 2
    out_bytes = Bt * _pad(POH, 8) * _pad(POWOC, 128) * 4
    vmem_bytes = 2 * (in_bytes + w_bytes + out_bytes) + (1 << 20)
    vmem_limit = int(min(48 * 2**20, max(16 * 2**20, 2 * vmem_bytes)))

    out = pl.pallas_call(
        kernel_fn,
        out_shape=jax.ShapeDtypeStruct((B, POH, POWOC), out_dtype),
        grid=(B // Bt,),
        in_specs=[
            pl.BlockSpec((Bt, 2, HP2, WPIC), lambda b: (b, 0, 0, 0)),
            pl.BlockSpec((K, WPIC, OWOC), lambda b: (0, 0, 0)),
        ],
        out_specs=pl.BlockSpec((Bt, POH, POWOC), lambda b: (b, 0, 0)),
        compiler_params=pltpu.CompilerParams(
            dimension_semantics=("parallel",),
            vmem_limit_bytes=vmem_limit,
        ),
    )(xsh, w2)

    # lane-dense (B, POH, POW*OC) -> 'b d h w -> b (h w) d'
    return out.reshape(B, POH * POW, OC)


if __name__ == "__main__":
    key = jax.random.PRNGKey(0)
    B, IC, H, W = 2, 4, 16, 16   # small shapes consistent with the module
    OC, K = 32, 7

    k1, k2, k3 = jax.random.split(key, 3)
    x = jax.random.normal(k1, (B, IC, H, W), jnp.float32)
    # NOTE: PyTorch registers `weight` as a zeros buffer (init_weight never touches
    # it); deterministic random values exercise nontrivial compute instead.
    rep_weight = jax.random.normal(k2, (OC, IC, K, K), jnp.float32) * 0.1
    # convmap = nn.Conv2d(OC*IC, OC*IC, 3, groups=OC*IC, bias=False), kaiming init:
    # std = sqrt(2 / fan_in), fan_in = 1*3*3 = 9
    convmap_w = jax.random.normal(k3, (OC * IC, 1, 3, 3), jnp.float32) * (2.0 / 9.0) ** 0.5

    out = jax.block_until_ready(conv_embed_forward(x, rep_weight, convmap_w))

    # --- pure-JAX reference (same bf16 operand quantization, f32 accumulation) ---
    origin = rep_weight.reshape(1, OC * IC, K, K)
    mapped = lax.conv_general_dilated(
        origin, convmap_w, (1, 1), ((1, 1), (1, 1)),
        dimension_numbers=('NCHW', 'OIHW', 'NCHW'), feature_group_count=OC * IC)
    kernel_eff = rep_weight + mapped.reshape(OC, IC, K, K)
    x_q = x.astype(jnp.bfloat16).astype(jnp.float32)
    k_q = kernel_eff.astype(jnp.bfloat16).astype(jnp.float32)
    conv_ref = lax.conv_general_dilated(
        x_q, k_q, (2, 2), ((3, 3), (3, 3)),
        dimension_numbers=('NCHW', 'OIHW', 'NCHW'),
        precision=lax.Precision.HIGHEST)
    relu_ref = jnp.maximum(conv_ref, 0.0)
    pool_out = lax.reduce_window(relu_ref, -jnp.inf, lax.max,
                                 (1, 1, 3, 3), (1, 1, 2, 2),
                                 ((0, 0), (0, 0), (1, 1), (1, 1)))
    ref = jnp.transpose(pool_out, (0, 2, 3, 1)).reshape(B, -1, OC)

    assert out.shape == (B, 16, OC), out.shape
    max_err = float(jnp.max(jnp.abs(out - ref)))
    assert jnp.allclose(out, ref, atol=5e-3, rtol=5e-3), max_err
    print("KERNEL_OK")
</pallas_src>

<mosaic_0001>
module attributes {stable_mosaic.version = 11 : i64} {
  func.func @_conv_embed_kernel(%arg0: i32, %arg1: memref<1x2x11x88xbf16, #tpu.memory_space<vmem>>, %arg2: memref<7x88x256xbf16, #tpu.memory_space<vmem>>, %arg3: memref<1x4x128xf32, #tpu.memory_space<vmem>>) attributes {dimension_semantics = [#tpu.dimension_semantics<parallel>], iteration_bounds = array<i64: 2>, scalar_prefetch = 0 : i64, scratch_operands = 0 : i64, tpu.core_type = #tpu.core_type<tc>, window_params = [{transform_indices = @transform_0, window_bounds = array<i64: 1, 2, 11, 88>}, {pipeline_mode = #tpu.pipeline_mode<synchronous>, transform_indices = @transform_1, window_bounds = array<i64: 7, 88, 256>}, {transform_indices = @transform_2, window_bounds = array<i64: 1, 4, 128>}]} {
    %cst = arith.constant 0.000000e+00 : f32
    %0 = vector.broadcast %cst : f32 to vector<8x256xf32>
    %c0 = arith.constant 0 : index
    %c0_0 = arith.constant 0 : index
    %c0_1 = arith.constant 0 : index
    %c0_2 = arith.constant 0 : index
    %1 = vector.load %arg1[%c0, %c0_0, %c0_1, %c0_2] : memref<1x2x11x88xbf16, #tpu.memory_space<vmem>>, vector<1x1x8x88xbf16>
    %2 = vector.shape_cast %1 : vector<1x1x8x88xbf16> to vector<1x8x88xbf16>
    %3 = vector.shape_cast %2 : vector<1x8x88xbf16> to vector<8x88xbf16>
    %c0_3 = arith.constant 0 : index
    %c0_4 = arith.constant 0 : index
    %c0_5 = arith.constant 0 : index
    %4 = vector.load %arg2[%c0_3, %c0_4, %c0_5] : memref<7x88x256xbf16, #tpu.memory_space<vmem>>, vector<1x88x256xbf16>
    %5 = vector.shape_cast %4 : vector<1x88x256xbf16> to vector<88x256xbf16>
    %cst_6 = arith.constant dense<0.000000e+00> : vector<8x256xf32>
    %6 = tpu.matmul %3, %5, %cst_6 {dimension_numbers = #tpu.dot_dimension_numbers<[1], [0], [0], [1], [0, 0, 1, 1], [], []>} : vector<8x88xbf16>, vector<88x256xbf16>, vector<8x256xf32> -> vector<8x256xf32>
    %7 = arith.addf %0, %6 : vector<8x256xf32>
    %c0_7 = arith.constant 0 : index
    %c1 = arith.constant 1 : index
    %c0_8 = arith.constant 0 : index
    %c0_9 = arith.constant 0 : index
    %8 = vector.load %arg1[%c0_7, %c1, %c0_8, %c0_9] : memref<1x2x11x88xbf16, #tpu.memory_space<vmem>>, vector<1x1x8x88xbf16>
    %9 = vector.shape_cast %8 : vector<1x1x8x88xbf16> to vector<1x8x88xbf16>
    %10 = vector.shape_cast %9 : vector<1x8x88xbf16> to vector<8x88xbf16>
    %c1_10 = arith.constant 1 : index
    %c0_11 = arith.constant 0 : index
    %c0_12 = arith.constant 0 : index
    %11 = vector.load %arg2[%c1_10, %c0_11, %c0_12] : memref<7x88x256xbf16, #tpu.memory_space<vmem>>, vector<1x88x256xbf16>
    %12 = vector.shape_cast %11 : vector<1x88x256xbf16> to vector<88x256xbf16>
    %cst_13 = arith.constant dense<0.000000e+00> : vector<8x256xf32>
    %13 = tpu.matmul %10, %12, %cst_13 {dimension_numbers = #tpu.dot_dimension_numbers<[1], [0], [0], [1], [0, 0, 1, 1], [], []>} : vector<8x88xbf16>, vector<88x256xbf16>, vector<8x256xf32> -> vector<8x256xf32>
    %14 = arith.addf %7, %13 : vector<8x256xf32>
    %c0_14 = arith.constant 0 : index
    %c0_15 = arith.constant 0 : index
    %c1_16 = arith.constant 1 : index
    %c0_17 = arith.constant 0 : index
    %15 = vector.load %arg1[%c0_14, %c0_15, %c1_16, %c0_17] : memref<1x2x11x88xbf16, #tpu.memory_space<vmem>>, vector<1x1x8x88xbf16>
    %16 = vector.shape_cast %15 : vector<1x1x8x88xbf16> to vector<1x8x88xbf16>
    %17 = vector.shape_cast %16 : vector<1x8x88xbf16> to vector<8x88xbf16>
    %c2 = arith.constant 2 : index
    %c0_18 = arith.constant 0 : index
    %c0_19 = arith.constant 0 : index
    %18 = vector.load %arg2[%c2, %c0_18, %c0_19] : memref<7x88x256xbf16, #tpu.memory_space<vmem>>, vector<1x88x256xbf16>
    %19 = vector.shape_cast %18 : vector<1x88x256xbf16> to vector<88x256xbf16>
    %cst_20 = arith.constant dense<0.000000e+00> : vector<8x256xf32>
    %20 = tpu.matmul %17, %19, %cst_20 {dimension_numbers = #tpu.dot_dimension_numbers<[1], [0], [0], [1], [0, 0, 1, 1], [], []>} : vector<8x88xbf16>, vector<88x256xbf16>, vector<8x256xf32> -> vector<8x256xf32>
    %21 = arith.addf %14, %20 : vector<8x256xf32>
    %c0_21 = arith.constant 0 : index
    %c1_22 = arith.constant 1 : index
    %c1_23 = arith.constant 1 : index
    %c0_24 = arith.constant 0 : index
    %22 = vector.load %arg1[%c0_21, %c1_22, %c1_23, %c0_24] : memref<1x2x11x88xbf16, #tpu.memory_space<vmem>>, vector<1x1x8x88xbf16>
    %23 = vector.shape_cast %22 : vector<1x1x8x88xbf16> to vector<1x8x88xbf16>
    %24 = vector.shape_cast %23 : vector<1x8x88xbf16> to vector<8x88xbf16>
    %c3 = arith.constant 3 : index
    %c0_25 = arith.constant 0 : index
    %c0_26 = arith.constant 0 : index
    %25 = vector.load %arg2[%c3, %c0_25, %c0_26] : memref<7x88x256xbf16, #tpu.memory_space<vmem>>, vector<1x88x256xbf16>
    %26 = vector.shape_cast %25 : vector<1x88x256xbf16> to vector<88x256xbf16>
    %cst_27 = arith.constant dense<0.000000e+00> : vector<8x256xf32>
    %27 = tpu.matmul %24, %26, %cst_27 {dimension_numbers = #tpu.dot_dimension_numbers<[1], [0], [0], [1], [0, 0, 1, 1], [], []>} : vector<8x88xbf16>, vector<88x256xbf16>, vector<8x256xf32> -> vector<8x256xf32>
    %28 = arith.addf %21, %27 : vector<8x256xf32>
    %c0_28 = arith.constant 0 : index
    %c0_29 = arith.constant 0 : index
    %c2_30 = arith.constant 2 : index
    %c0_31 = arith.constant 0 : index
    %29 = vector.load %arg1[%c0_28, %c0_29, %c2_30, %c0_31] : memref<1x2x11x88xbf16, #tpu.memory_space<vmem>>, vector<1x1x8x88xbf16>
    %30 = vector.shape_cast %29 : vector<1x1x8x88xbf16> to vector<1x8x88xbf16>
    %31 = vector.shape_cast %30 : vector<1x8x88xbf16> to vector<8x88xbf16>
    %c4 = arith.constant 4 : index
    %c0_32 = arith.constant 0 : index
    %c0_33 = arith.constant 0 : index
    %32 = vector.load %arg2[%c4, %c0_32, %c0_33] : memref<7x88x256xbf16, #tpu.memory_space<vmem>>, vector<1x88x256xbf16>
    %33 = vector.shape_cast %32 : vector<1x88x256xbf16> to vector<88x256xbf16>
    %cst_34 = arith.constant dense<0.000000e+00> : vector<8x256xf32>
    %34 = tpu.matmul %31, %33, %cst_34 {dimension_numbers = #tpu.dot_dimension_numbers<[1], [0], [0], [1], [0, 0, 1, 1], [], []>} : vector<8x88xbf16>, vector<88x256xbf16>, vector<8x256xf32> -> vector<8x256xf32>
    %35 = arith.addf %28, %34 : vector<8x256xf32>
    %c0_35 = arith.constant 0 : index
    %c1_36 = arith.constant 1 : index
    %c2_37 = arith.constant 2 : index
    %c0_38 = arith.constant 0 : index
    %36 = vector.load %arg1[%c0_35, %c1_36, %c2_37, %c0_38] : memref<1x2x11x88xbf16, #tpu.memory_space<vmem>>, vector<1x1x8x88xbf16>
    %37 = vector.shape_cast %36 : vector<1x1x8x88xbf16> to vector<1x8x88xbf16>
    %38 = vector.shape_cast %37 : vector<1x8x88xbf16> to vector<8x88xbf16>
    %c5 = arith.constant 5 : index
    %c0_39 = arith.constant 0 : index
    %c0_40 = arith.constant 0 : index
    %39 = vector.load %arg2[%c5, %c0_39, %c0_40] : memref<7x88x256xbf16, #tpu.memory_space<vmem>>, vector<1x88x256xbf16>
    %40 = vector.shape_cast %39 : vector<1x88x256xbf16> to vector<88x256xbf16>
    %cst_41 = arith.constant dense<0.000000e+00> : vector<8x256xf32>
    %41 = tpu.matmul %38, %40, %cst_41 {dimension_numbers = #tpu.dot_dimension_numbers<[1], [0], [0], [1], [0, 0, 1, 1], [], []>} : vector<8x88xbf16>, vector<88x256xbf16>, vector<8x256xf32> -> vector<8x256xf32>
    %42 = arith.addf %35, %41 : vector<8x256xf32>
    %c0_42 = arith.constant 0 : index
    %c0_43 = arith.constant 0 : index
    %c3_44 = arith.constant 3 : index
    %c0_45 = arith.constant 0 : index
    %43 = vector.load %arg1[%c0_42, %c0_43, %c3_44, %c0_45] : memref<1x2x11x88xbf16, #tpu.memory_space<vmem>>, vector<1x1x8x88xbf16>
    %44 = vector.shape_cast %43 : vector<1x1x8x88xbf16> to vector<1x8x88xbf16>
    %45 = vector.shape_cast %44 : vector<1x8x88xbf16> to vector<8x88xbf16>
    %c6 = arith.constant 6 : index
    %c0_46 = arith.constant 0 : index
    %c0_47 = arith.constant 0 : index
    %46 = vector.load %arg2[%c6, %c0_46, %c0_47] : memref<7x88x256xbf16, #tpu.memory_space<vmem>>, vector<1x88x256xbf16>
    %47 = vector.shape_cast %46 : vector<1x88x256xbf16> to vector<88x256xbf16>
    %cst_48 = arith.constant dense<0.000000e+00> : vector<8x256xf32>
    %48 = tpu.matmul %45, %47, %cst_48 {dimension_numbers = #tpu.dot_dimension_numbers<[1], [0], [0], [1], [0, 0, 1, 1], [], []>} : vector<8x88xbf16>, vector<88x256xbf16>, vector<8x256xf32> -> vector<8x256xf32>
    %49 = arith.addf %42, %48 : vector<8x256xf32>
    %cst_49 = arith.constant 0.000000e+00 : f32
    %50 = vector.broadcast %cst_49 : f32 to vector<8x256xf32>
    %51 = arith.maximumf %49, %50 : vector<8x256xf32>
    %cst_50 = arith.constant 0.000000e+00 : f32
    %52 = vector.broadcast %cst_50 : f32 to vector<8x32xf32>
    %53 = vector.extract_strided_slice %51 {offsets = [0, 0], sizes = [8, 224], strides = [1, 1]} : vector<8x256xf32> to vector<8x224xf32>
    %54 = tpu.concatenate %52, %53 in 1 : vector<8x32xf32>, vector<8x224xf32> -> vector<8x256xf32>
    %55 = vector.extract_strided_slice %51 {offsets = [0, 32], sizes = [8, 224], strides = [1, 1]} : vector<8x256xf32> to vector<8x224xf32>
    %56 = tpu.concatenate %55, %52 in 1 : vector<8x224xf32>, vector<8x32xf32> -> vector<8x256xf32>
    %57 = arith.maximumf %51, %54 : vector<8x256xf32>
    %58 = arith.maximumf %57, %56 : vector<8x256xf32>
    %59 = vector.extract_strided_slice %58 {offsets = [0, 0], sizes = [8, 32], strides = [1, 1]} : vector<8x256xf32> to vector<8x32xf32>
    %60 = vector.extract_strided_slice %58 {offsets = [0, 64], sizes = [8, 32], strides = [1, 1]} : vector<8x256xf32> to vector<8x32xf32>
    %61 = vector.extract_strided_slice %58 {offsets = [0, 128], sizes = [8, 32], strides = [1, 1]} : vector<8x256xf32> to vector<8x32xf32>
    %62 = vector.extract_strided_slice %58 {offsets = [0, 192], sizes = [8, 32], strides = [1, 1]} : vector<8x256xf32> to vector<8x32xf32>
    %63 = tpu.concatenate %59, %60, %61, %62 in 1 : vector<8x32xf32>, vector<8x32xf32>, vector<8x32xf32>, vector<8x32xf32> -> vector<8x128xf32>
    %64 = vector.shape_cast %63 : vector<8x128xf32> to vector<1x4x2x128xf32>
    %65 = vector.extract_strided_slice %64 {offsets = [0, 0, 0, 0], sizes = [1, 4, 1, 128], strides = [1, 1, 1, 1]} : vector<1x4x2x128xf32> to vector<1x4x1x128xf32>
    %66 = vector.shape_cast %65 : vector<1x4x1x128xf32> to vector<1x4x128xf32>
    %67 = vector.extract_strided_slice %64 {offsets = [0, 0, 1, 0], sizes = [1, 4, 1, 128], strides = [1, 1, 1, 1]} : vector<1x4x2x128xf32> to vector<1x4x1x128xf32>
    %68 = vector.shape_cast %67 : vector<1x4x1x128xf32> to vector<1x4x128xf32>
    %cst_51 = arith.constant 0.000000e+00 : f32
    %69 = vector.broadcast %cst_51 : f32 to vector<1x1x128xf32>
    %70 = vector.extract_strided_slice %68 {offsets = [0, 0, 0], sizes = [1, 3, 128], strides = [1, 1, 1]} : vector<1x4x128xf32> to vector<1x3x128xf32>
    %71 = tpu.concatenate %69, %70 in 1 : vector<1x1x128xf32>, vector<1x3x128xf32> -> vector<1x4x128xf32>
    %72 = arith.maximumf %66, %68 : vector<1x4x128xf32>
    %73 = arith.maximumf %72, %71 : vector<1x4x128xf32>
    %c0_52 = arith.constant 0 : index
    %c0_53 = arith.constant 0 : index
    %c0_54 = arith.constant 0 : index
    %74 = vector.load %arg3[%c0_52, %c0_53, %c0_54] : memref<1x4x128xf32, #tpu.memory_space<vmem>>, vector<1x4x128xf32>
    tpu.vector_store %arg3[%c0_52, %c0_53, %c0_54], %73 {strides = array<i32>} : memref<1x4x128xf32, #tpu.memory_space<vmem>>, vector<1x4x128xf32>,
    return
  }
  func.func @transform_0(%arg0: i32) -> (i32, i32, i32, i32) {
    %c0_i32 = arith.constant 0 : i32
    %c0_i32_0 = arith.constant 0 : i32
    %c0_i32_1 = arith.constant 0 : i32
    %c0_i32_2 = arith.constant 0 : i32
    return %arg0, %c0_i32, %c0_i32_0, %c0_i32_1 : i32, i32, i32, i32
  }
  func.func @transform_1(%arg0: i32) -> (i32, i32, i32) {
    %c0_i32 = arith.constant 0 : i32
    %c0_i32_0 = arith.constant 0 : i32
    %c0_i32_1 = arith.constant 0 : i32
    %c0_i32_2 = arith.constant 0 : i32
    return %c0_i32, %c0_i32_0, %c0_i32_1 : i32, i32, i32
  }
  func.func @transform_2(%arg0: i32) -> (i32, i32, i32) {
    %c0_i32 = arith.constant 0 : i32
    %c0_i32_0 = arith.constant 0 : i32
    %c0_i32_1 = arith.constant 0 : i32
    return %arg0, %c0_i32, %c0_i32_0 : i32, i32, i32
  }
}

</mosaic_0001>

<bundles_post_ra>
// kernel: tpu_custom_call.1
= control target key start
LH: loop header
LB: loop body
LE: loop exit
PB: predicated region body
PF: predicated region fallthrough
CT: control target
= control target key end

     0   :  { %7 = vsyncpa [#allocation3], 0  ;;  %s1863_s0 = inlined_call_operand.vmem [shape: bf16[2,2,11,88], index: 0, kind: input, shape index: {}]   ;;  %s1864_s1 = inlined_call_operand.hbm [shape: bf16[7,88,256], index: 1, kind: input, shape index: {}]   ;;  %s1865_s2 = inlined_call_operand.hbm [shape: f32[2,4,128], index: 2, kind: output, shape index: {}]  }
   0x1   :  { %8 = vsyncpa [#allocation4], 0 }
   0x2   :  { %10 = vsyncpa [#allocation4 + $0x1], 0  ;;  %s1691_s9 = smov 0   ;;  %s1693_s10 = smov 0  }
   0x3   :  { %s1695_s11 = smov 0   ;;  %s1697_s12 = smov 0  }
   0x4 LB: > { %s1712_s13 = sadd.s32 4294967295, %s1665_s12   ;;  %s1269_s14 = sadd.s32 4294967294, %s1665_s12   ;;  %s1665_s12 = sphi %s1697_s12, %s1873_s12   ;;  %s1661_s11 = sphi %s1695_s11, %s1872_s11   ;;  %s1657_s10 = sphi %s1693_s10, %s1871_s10   ;;  %s1653_s9 = sphi %s1691_s9, %s1870_s9  }
   0x5   : > { %s1716_s15 = sadd.s32 1, %s1665_s12   ;;  %s70_s16 = sadd.s32 1, %s1661_s11 }
   0x6   : > { %s67_s17 = ssub.s32 %s1665_s12, %s1716_s15  ;;  %p80_p0 = scmp.ne.s32.totalorder %s1661_s11, %s1657_s10 }
   0x7   : > { %p68_p1 = scmp.eq.s32.totalorder %s67_s17, 0  ;;  %p81_p2 = scmp.eq.s32.totalorder %s1712_s13, 1 }
   0x8   : > { %p86_p3 = scmp.ne.s32.totalorder %s1657_s10, %s1653_s9  ;;  %p87_p4 = scmp.eq.s32.totalorder %s1269_s14, 1 }
   0x9   : > { %s1727_s18 = scalar_select %p68_p1, %s1661_s11, %s70_s16  }
   0xa   : > { %p1729_p5 = por %p81_p2, %p80_p0  ;;  %p1733_p6 = por %p87_p4, %p86_p3 }
   0xb   : > { %p1270_p7 = scmp.ge.s32.totalorder %s1665_s12, 1  ;;  %p94_p8 = scmp.lt.s32.totalorder %s1665_s12, 3 }
   0xc   : > { %s1867_s20 = scalar_select %p1733_p6, 1, 0 }
   0xd   : > { %p1408_p9 = scmp.eq.s32.totalorder %s1712_s13, 0  ;;  %p1740_p10 = pnand %p1270_p7, %p94_p8 }
   0xe   : > { %s1667_s22 = smov [#allocation2]  }
   0xf   : > { %s106_s23 = sshll.u32 %s1667_s22, 4  ;;  %p1400_p11 = pneg %p1740_p10  ;;  %s107_s23 = int_to_ptr.vmem [resolvable:$true] %s106_s23 }
  0x10   : > { %s1586_s24 = scalar_lea.vmem %s107_s23, 9856  ;;  %p1594_p3 = scmp.lt.s32.totalorder %s107_s23, %s107_s23 }
  0x11   : > { %p1401_p12 = pnand %p1408_p9, %p1400_p11  ;;  %p1587_p0 = scmp.ne.s32.totalorder %s107_s23, %s1586_s24 }
  0x12   : > { %p1595_p4 = scmp.lt.s32.totalorder %s1586_s24, %s1586_s24 }
  0x13   : > { %p1577_p13 = pneg %p1401_p12 }
  0x14   : > { %p1596_p6 = por %p1595_p4, %p1594_p3 }
  0x15   : > { %p1589_p1 = pnand %p1587_p0, %p1577_p13 }
  0x17   : > { %p1590_p2 = pneg %p1589_p1 }
  0x19   : > { %p1597_p7 = pnand %p1596_p6, %p1590_p2 }
  0x1b   : > { %1600 = shalt.err (!%p1597_p7)
}
  0x1c   : > { %s1668_s25 = smov 128   ;;  %s1669_s26 = smov 8  }
  0x1d   : > { %1403 = dma.hbm_to_vmem [thread:$0]  (!%p1401_p12), %s1864_s1, 9856, %s107_s23, [#allocation3], %s1668_s25, %s1668_s25, %s1669_s26  }
  0x1e   : > { %130 = sbr.rel (%p1740_p10) target bundleno = 607 (0x25f), region = 28 }
  0x23   : > { %1644 = dma.done.wait (%p1408_p9), [#allocation3], 9856  }
  0x24   : > { %1646 = vsyncadd (%p1408_p9), [#allocation3], 4294957440  ;;  %v1670_v0 = vmov 0   ;;  %v183_v1 = vld [vmem:[#allocation2 + $0xa8] sm:$0xff]  ;;  %vm243_vm0 = vcmask 1043456   ;;  %v169_v2 = vld [vmem:[#allocation2 + $0x50] sm:$0xff] }
  0x25   : > { %282 = vmatprep.mubr.bf16.mxu0 %v1670_v0  ;;  %387 = vmatprep.mubr.bf16.mxu1 %v1670_v0  ;;  %v1290_v3 = vcombine.high %v183_v1, %v183_v1  ;;  %v1304_v4 = vcombine.high %v169_v2, %v169_v2  ;;  %v1289_v5 = vcombine.low %v183_v1, %v183_v1  ;;  %v1455_v7 = vld [vmem:[#allocation2 + $0x9c] ss:$8 sps:$4 sm:$0xff]   ;;  %v1459_v11 = vld [vmem:[#allocation2 + $0x98] ss:$8 sps:$4 sm:$0xff]   ;;  %v1461_v13 = vld [vmem:[#allocation2 + $0x8c] ss:$8 sps:$4 sm:$0xff]  }
  0x26   : > { %v1303_v6 = vcombine.low %v169_v2, %v169_v2  ;;  %v1457_v8 = vld [vmem:[#allocation2 + $0x44] ss:$8 sps:$4 sm:$0xff]   ;;  %v1460_v12 = vld [vmem:[#allocation2 + $0x40] ss:$8 sps:$4 sm:$0xff]   ;;  %v1463_v14 = vld [vmem:[#allocation2 + $0x34] ss:$8 sps:$4 sm:$0xff]  }
  0x27   : > { %1291 = vmatprep.subr.msk.bf16.mxu0 %vm243_vm0, %v1290_v3  ;;  %1305 = vmatprep.subr.msk.bf16.mxu1 %vm243_vm0, %v1304_v4  ;;  %v245_v9 = vsel %vm243_vm0, %v1289_v5, 0  ;;  %v1465_v15 = vld [vmem:[#allocation2 + $0x88] ss:$8 sps:$4 sm:$0xff]   ;;  %v1467_v17 = vld [vmem:[#allocation2 + $0x7c] ss:$8 sps:$4 sm:$0xff]   ;;  %p152_p6 = scmp.lt.s32.totalorder %s1712_s13, 1 }
  0x28   : > { %v350_v10 = vsel %vm243_vm0, %v1303_v6, 0  ;;  %255 = vmatpush1.bf16.msra.mxu0 %v245_v9  ;;  %v1466_v16 = vld [vmem:[#allocation2 + $0x30] ss:$8 sps:$4 sm:$0xff]   ;;  %v1469_v18 = vld [vmem:[#allocation2 + $0x24] ss:$8 sps:$4 sm:$0xff]   ;;  %vm239_vm1 = vcmask 719872  }
  0x29   : > { %360 = vmatpush1.bf16.msra.mxu1 %v350_v10  ;;  %256 = vmatprep.subr.bf16.mxu0 %v1455_v7  ;;  %v1471_v19 = vld [vmem:[#allocation2 + $0x78] ss:$8 sps:$4 sm:$0xff]   ;;  %v1473_v21 = vld [vmem:[#allocation2 + $0x6c] ss:$8 sps:$4 sm:$0xff]   ;;  %s153_s29 = scalar_select %p152_p6, %s1712_s13, 1  ;;  %vm1049_vm2 = vcmask 261120  }
  0x2a   : > { %361 = vmatprep.subr.bf16.mxu1 %v1457_v8  ;;  %v1472_v20 = vld [vmem:[#allocation2 + $0x20] ss:$8 sps:$4 sm:$0xff]   ;;  %v1475_v22 = vld [vmem:[#allocation2 + $0x14] ss:$8 sps:$4 sm:$0xff]   ;;  %v1478_v24 = vld [vmem:[#allocation2 + $0x10] ss:$8 sps:$4 sm:$0xff]  }
  0x2b   : > { %v1477_v23 = vld [vmem:[#allocation2 + $0x68] ss:$8 sps:$4 sm:$0xff]   ;;  %v1479_v25 = vld [vmem:[#allocation2 + $0x5c] ss:$8 sps:$4 sm:$0xff]   ;;  %s1393_s30 = sshll.u32 %s153_s29, 4  ;;  %s1671_s6 = smov 96  }
  0x2c   : > { %257 = vmatpush1.bf16.msra.mxu0 %v1459_v11  ;;  %v1481_v26 = vld [vmem:[#allocation2 + $0x4] ss:$8 sps:$4 sm:$0xff]   ;;  %v542_v28 = vld [vmem:[#allocation2 + $0x158] sm:$0xff]  ;;  %v1484_v30 = vld [vmem:[#allocation2] ss:$8 sps:$4 sm:$0xff]   ;;  %s1768_s5 = scalar_lea.vmem %s1863_s0, %s1393_s30  ;;  %s1672_s7 = smov 32  }
  0x2d   : > { %362 = vmatpush1.bf16.msra.mxu1 %v1460_v12  ;;  %258 = vmatprep.subr.bf16.mxu0 %v1461_v13  ;;  %v409_v27 = vld [vmem:[#allocation2 + $0x100] sm:$0xff]  ;;  %v1336_v33 = vcombine.high %v542_v28, %v542_v28  ;;  %v1335_v34 = vcombine.low %v542_v28, %v542_v28  ;;  %v1278_v35 = vld [vmem:[%s1768_s5 + $0x8] sm:$0xf]  ;;  %v1491_v37 = vld [vmem:[#allocation2 + $0xf4] ss:$8 sps:$4 sm:$0xff]   ;;  %vm1058_vm3 = vcmask 785408  }
  0x2e   : > { %363 = vmatprep.subr.bf16.mxu1 %v1463_v14  ;;  %v1483_v29 = vld [vmem:[#allocation2 + $0x58] ss:$8 sps:$4 sm:$0xff]   ;;  %v1319_v31 = vcombine.high %v409_v27, %v409_v27  ;;  %v1318_v32 = vcombine.low %v409_v27, %v409_v27  ;;  %v1494_v40 = vld [vmem:[#allocation2 + $0x14c] ss:$8 sps:$4 sm:$0xff]   ;;  %v1492_v42 = vld [vmem:[#allocation2 + $0x148] ss:$8 sps:$4 sm:$0xff]  }
  0x2f   : > { %v158_v36 = vld [vmem:[%s1768_s5] sm:$0xf]  ;;  %v614_v39 = vsel %vm243_vm0, %v1335_v34, 0  ;;  %v1489_v41 = vld [vmem:[#allocation2 + $0xf0] ss:$8 sps:$4 sm:$0xff]   ;;  %v798_v3 = vld [vmem:[#allocation2 + $0x208] sm:$0xff] }
  0x30   : > { %259 = vmatpush1.bf16.msra.mxu0 %v1465_v15  ;;  %v481_v38 = vsel %vm243_vm0, %v1318_v32, 0  ;;  %v1497_v43 = vld [vmem:[#allocation2 + $0xe4] ss:$8 sps:$4 sm:$0xff]   ;;  %v1495_v45 = vld [vmem:[#allocation2 + $0xe0] ss:$8 sps:$4 sm:$0xff]   ;;  %v674_v2 = vld [vmem:[#allocation2 + $0x1b0] sm:$0xff]  ;;  %v1367_v12 = vcombine.high %v798_v3, %v798_v3  ;;  %v1366_v13 = vcombine.low %v798_v3, %v798_v3 }
  0x31   : > { %364 = vmatpush1.bf16.msra.mxu1 %v1466_v16  ;;  %260 = vmatprep.subr.bf16.mxu0 %v1467_v17  ;;  %v1500_v44 = vld [vmem:[#allocation2 + $0x13c] ss:$8 sps:$4 sm:$0xff]   ;;  %v1498_v46 = vld [vmem:[#allocation2 + $0x138] ss:$8 sps:$4 sm:$0xff]   ;;  %v1322_v49 = vld [vmem:[%s1768_s5 + $0x8] sm:$0xf]  ;;  %v1351_v10 = vcombine.high %v674_v2, %v674_v2  ;;  %v1350_v11 = vcombine.low %v674_v2, %v674_v2 }
  0x32   : > { %365 = vmatprep.subr.bf16.mxu1 %v1469_v18  ;;  %v396_v47 = vld [vmem:[%s1768_s5] sm:$0xf]  ;;  %v1781_v48 = vld [vmem:[%s1768_s5 + $0x4] sm:$0x1]  ;;  %v1786_v50 = vld [vmem:[%s1768_s5 + $0xc] sm:$0x1] }
  0x33   : > { %v1503_v51 = vld [vmem:[#allocation2 + $0xd4] ss:$8 sps:$4 sm:$0xff]   ;;  %v1501_v53 = vld [vmem:[#allocation2 + $0xd0] ss:$8 sps:$4 sm:$0xff]   ;;  %v1307_v54 = vcombine.low %v396_v47, %v1781_v48  ;;  %v1324_v55 = vcombine.low %v1322_v49, %v1786_v50  ;;  %v1509_v57 = vld [vmem:[#allocation2 + $0xc4] ss:$8 sps:$4 sm:$0xff]  }
  0x34   : > { %261 = vmatpush1.bf16.msra.mxu0 %v1471_v19  ;;  %v1506_v52 = vld [vmem:[#allocation2 + $0x12c] ss:$8 sps:$4 sm:$0xff]   ;;  %v1504_v56 = vld [vmem:[#allocation2 + $0x128] ss:$8 sps:$4 sm:$0xff]   ;;  %v1512_v58 = vld [vmem:[#allocation2 + $0x11c] ss:$8 sps:$4 sm:$0xff]  }
  0x35   : > { %366 = vmatpush1.bf16.msra.mxu1 %v1472_v20  ;;  %262 = vmatprep.subr.bf16.mxu0 %v1473_v21  ;;  %v1507_v59 = vld [vmem:[#allocation2 + $0xc0] ss:$8 sps:$4 sm:$0xff]   ;;  %v418_v61 = vshll.u32 %v1307_v54, 16  ;;  %v551_v62 = vshll.u32 %v1324_v55, 16  ;;  %v1515_v63 = vld [vmem:[#allocation2 + $0xb4] ss:$8 sps:$4 sm:$0xff]  }
  0x36   : > { %367 = vmatprep.subr.bf16.mxu1 %v1475_v22  ;;  %v1510_v60 = vld [vmem:[#allocation2 + $0x118] ss:$8 sps:$4 sm:$0xff]   ;;  %v1518_v1 = vld [vmem:[#allocation2 + $0x10c] ss:$8 sps:$4 sm:$0xff]   ;;  %v416_v4 = vshrl.u32 %v1307_v54, 16  ;;  %v549_v6 = vshrl.u32 %v1324_v55, 16 }
  0x37   : > { %v420_v5 = vrot.slane %v418_v61, 1  ;;  %v553_v7 = vrot.slane %v551_v62, 1  ;;  %v1513_v8 = vld [vmem:[#allocation2 + $0xb0] ss:$8 sps:$4 sm:$0xff]   ;;  %v1527_v16 = vld [vmem:[#allocation2 + $0x1a4] ss:$8 sps:$4 sm:$0xff]  }
  0x38   : > { %263 = vmatpush1.bf16.msra.mxu0 %v1477_v23  ;;  %v1516_v9 = vld [vmem:[#allocation2 + $0x108] ss:$8 sps:$4 sm:$0xff]   ;;  %v738_v17 = vsel %vm243_vm0, %v1350_v11, 0  ;;  %v862_v18 = vsel %vm243_vm0, %v1366_v13, 0  ;;  %v1530_v19 = vld [vmem:[#allocation2 + $0x1fc] ss:$8 sps:$4 sm:$0xff]  }
  0x39   : > { %368 = vmatpush1.bf16.msra.mxu1 %v1478_v24  ;;  %264 = vmatprep.subr.bf16.mxu0 %v1479_v25  ;;  %v421_v14 = vor.u32 %v420_v5, %v416_v4  ;;  %v554_v15 = vor.u32 %v553_v7, %v549_v6  ;;  %v1525_v20 = vld [vmem:[#allocation2 + $0x1a0] ss:$8 sps:$4 sm:$0xff]   ;;  %v1533_v22 = vld [vmem:[#allocation2 + $0x194] ss:$8 sps:$4 sm:$0xff]   ;;  %v1531_v24 = vld [vmem:[#allocation2 + $0x190] ss:$8 sps:$4 sm:$0xff]  }
  0x3a   : > { %369 = vmatprep.subr.bf16.mxu1 %v1481_v26  ;;  %v1528_v21 = vld [vmem:[#allocation2 + $0x1f8] ss:$8 sps:$4 sm:$0xff]   ;;  %v1536_v23 = vld [vmem:[#allocation2 + $0x1ec] ss:$8 sps:$4 sm:$0xff]   ;;  %v1534_v25 = vld [vmem:[#allocation2 + $0x1e8] ss:$8 sps:$4 sm:$0xff]  }
  0x3b   : > { %v1539_v26 = vld [vmem:[#allocation2 + $0x184] ss:$8 sps:$4 sm:$0xff]   ;;  %v1537_v28 = vld [vmem:[#allocation2 + $0x180] ss:$8 sps:$4 sm:$0xff]   ;;  %v1543_v32 = vld [vmem:[#allocation2 + $0x170] ss:$8 sps:$4 sm:$0xff]  }
  0x3c   : > { %265 = vmatpush1.bf16.msra.mxu0 %v1483_v29  ;;  %v1542_v27 = vld [vmem:[#allocation2 + $0x1dc] ss:$8 sps:$4 sm:$0xff]   ;;  %v1540_v29 = vld [vmem:[#allocation2 + $0x1d8] ss:$8 sps:$4 sm:$0xff]   ;;  %s1673_s8 = smov 64   ;;  %vm1079_vm4 = vcmask 523264  }
  0x3d   : > { %370 = vmatpush1.bf16.msra.mxu1 %v1484_v30  ;;  %1320 = vmatprep.subr.msk.bf16.mxu0 %vm243_vm0, %v1319_v31  ;;  %v1545_v30 = vld [vmem:[#allocation2 + $0x174] ss:$8 sps:$4 sm:$0xff]   ;;  %v662_v34 = vld [vmem:[%s1768_s5] sm:$0xe]  ;;  %v1560_v49 = vld [vmem:[#allocation2 + $0x250] ss:$8 sps:$4 sm:$0xff]  }
  0x3e   : > { %1337 = vmatprep.subr.msk.bf16.mxu1 %vm243_vm0, %v1336_v33  ;;  %v1548_v31 = vld [vmem:[#allocation2 + $0x1cc] ss:$8 sps:$4 sm:$0xff]   ;;  %v1546_v33 = vld [vmem:[#allocation2 + $0x1c8] ss:$8 sps:$4 sm:$0xff]   ;;  %vm1116_vm5 = vcmask 1042434   ;;  %vm1118_vm6 = vcmask 1043459  }
  0x3f   : > { %1292 = vmatmul.mubr.msk.bf16.vlgmr.msra.gmra.mxu0 %vm239_vm1, %v1278_v35  ;;  %v1354_v35 = vld [vmem:[%s1768_s5 + $0x8] sm:$0xe]  ;;  %v1566_v55 = vld [vmem:[#allocation2 + $0x230] ss:$8 sps:$4 sm:$0xff]   ;;  %vm1121_vm7 = vcmask 1040384   ;;  %s149_s14 = sand.u32 1, %s1657_s10  }
  0x40   : > { %1306 = vmatmul.mubr.msk.bf16.vlgmr.msra.gmra.mxu1 %vm239_vm1, %v158_v36  ;;  %491 = vmatpush1.bf16.msra.mxu0 %v481_v38  ;;  %v1551_v36 = vld [vmem:[#allocation2 + $0x164] ss:$8 sps:$4 sm:$0xff]   ;;  %v1572_v62 = vld [vmem:[#allocation2 + $0x210] ss:$8 sps:$4 sm:$0xff]   ;;  %s1275_s16 = sshll.u32 %s149_s14, 2  ;;  %vm1178_vm8 = vcmask 1041409  }
  0x41   : > { %624 = vmatpush1.bf16.msra.mxu1 %v614_v39  ;;  %492 = vmatprep.subr.bf16.mxu0 %v1491_v37  ;;  %v1554_v37 = vld [vmem:[#allocation2 + $0x1bc] ss:$8 sps:$4 sm:$0xff]   ;;  %v1339_v39 = vcombine.low %v662_v34, %v1781_v48  ;;  %s1390_s17 = sshll.u32 %s1712_s13, 6  ;;  %s151_s21 = scalar_lea.vmem [#allocation5], %s1275_s16 }
  0x42   : > { %625 = vmatprep.subr.bf16.mxu1 %v1494_v40  ;;  %518 = vmatprep.mubr.bf16.mxu0 %v1670_v0  ;;  %v922_v38 = vld [vmem:[#allocation2 + $0x260] sm:$0xff]  ;;  %v1355_v40 = vcombine.low %v1354_v35, %v1786_v50  ;;  %v1562_v48 = vld [vmem:[#allocation2 + $0x254] ss:$8 sps:$4 sm:$0xff]   ;;  %s1198_s22 = sshll.u32 %s151_s21, 4  ;;  %s1825_s25 = scalar_lea.hbm %s1865_s2, %s1390_s17  ;;  %s1199_s22 = int_to_ptr.vmem [resolvable:$true] %s1198_s22 }
  0x43   : > { %651 = vmatprep.mubr.bf16.mxu1 %v1670_v0  ;;  %v1565_v50 = vld [vmem:[#allocation2 + $0x244] ss:$8 sps:$4 sm:$0xff]   ;;  %s1185_s26 = scalar_lea.sflag [#allocation4], %s149_s14  ;;  %s1601_s27 = scalar_lea.vmem %s1199_s22, 64 }
  0x44   : > { %493 = vmatpush1.bf16.msra.mxu0 %v1489_v41  ;;  %v1549_v41 = vld [vmem:[#allocation2 + $0x160] ss:$8 sps:$4 sm:$0xff]   ;;  %p1602_p8 = scmp.ne.s32.totalorder %s1199_s22, %s1601_s27  ;;  %s1675_s13 = smov [#allocation5]  }
  0x45   : > { %626 = vmatpush1.bf16.msra.mxu1 %v1492_v42  ;;  %494 = vmatprep.subr.bf16.mxu0 %v1497_v43  ;;  %v1552_v42 = vld [vmem:[#allocation2 + $0x1b8] ss:$8 sps:$4 sm:$0xff]   ;;  %v1382_v43 = vcombine.high %v922_v38, %v922_v38  ;;  %s1605_s28 = sshll.u32 %s1675_s13, 4  ;;  %s1606_s28 = int_to_ptr.vmem [resolvable:$false] %s1605_s28 }
  0x46   : > { %627 = vmatprep.subr.bf16.mxu1 %v1500_v44  ;;  %v1381_v44 = vcombine.low %v922_v38, %v922_v38  ;;  %p1603_p9 = pnand %p1602_p8, %p1729_p5  ;;  %s1607_s29 = scalar_lea.vmem %s1606_s28, 128 }
  0x47   : > { %p1608_p11 = scmp.lt.s32.totalorder %s1199_s22, %s1606_s28  ;;  %p1609_p12 = scmp.lt.s32.totalorder %s1607_s29, %s1601_s27 }
  0x48   : > { %495 = vmatpush1.bf16.msra.mxu0 %v1495_v45  ;;  %v678_v45 = vrot.slane %v1339_v39, 1  ;;  %v993_v47 = vsel %vm243_vm0, %v1381_v44, 0  ;;  %p1604_p10 = pneg %p1603_p9 }
  0x49   : > { %628 = vmatpush1.bf16.msra.mxu1 %v1498_v46  ;;  %496 = vmatprep.subr.bf16.mxu0 %v1503_v51  ;;  %v802_v46 = vrot.slane %v1355_v40, 1  ;;  %v910_v51 = vld [vmem:[%s1768_s5 + $0x4] sm:$0x3]  ;;  %p1610_p13 = por %p1609_p12, %p1608_p11 }
  0x4a   : > { %629 = vmatprep.subr.bf16.mxu1 %v1506_v52  ;;  %v1563_v52 = vld [vmem:[#allocation2 + $0x240] ss:$8 sps:$4 sm:$0xff]   ;;  %v1370_v54 = vcombine.low %v662_v34, %v910_v51 }
  0x4b   : > { %p1611_p0 = pnand %p1610_p13, %p1604_p10 }
  0x4c   : > { %497 = vmatpush1.bf16.msra.mxu0 %v1501_v53  ;;  %v1568_v53 = vld [vmem:[#allocation2 + $0x234] ss:$8 sps:$4 sm:$0xff]  }
  0x4d   : > { %630 = vmatpush1.bf16.msra.mxu1 %v1504_v56  ;;  %498 = vmatprep.subr.bf16.mxu0 %v1509_v57  ;;  %v1571_v56 = vld [vmem:[#allocation2 + $0x224] ss:$8 sps:$4 sm:$0xff]   ;;  %v927_v57 = vshrl.u32 %v1370_v54, 16 }
  0x4e   : > { %631 = vmatprep.subr.bf16.mxu1 %v1512_v58  ;;  %v930_v58 = vshll.u32 %v1370_v54, 16 }
  0x4f   : > { %v929_v61 = vrot.slane %v927_v57, 1  ;;  %v1087_v57 = vlaneseq }
  0x50   : > { %499 = vmatpush1.bf16.msra.mxu0 %v1507_v59  ;;  %v1569_v59 = vld [vmem:[#allocation2 + $0x220] ss:$8 sps:$4 sm:$0xff]  }
  0x51   : > { %632 = vmatpush1.bf16.msra.mxu1 %v1510_v60  ;;  %500 = vmatprep.subr.bf16.mxu0 %v1515_v63  ;;  %v1574_v60 = vld [vmem:[#allocation2 + $0x214] ss:$8 sps:$4 sm:$0xff]  }
  0x52   : > { %633 = vmatprep.subr.bf16.mxu1 %v1518_v1 }
  0x54   : > { %501 = vmatpush1.bf16.msra.mxu0 %v1513_v8 }
  0x55   : > { %634 = vmatpush1.bf16.msra.mxu1 %v1516_v9  ;;  %1352 = vmatprep.subr.msk.bf16.mxu0 %vm243_vm0, %v1351_v10 }
  0x56   : > { %1368 = vmatprep.subr.msk.bf16.mxu1 %vm243_vm0, %v1367_v12 }
  0x57   : > { %1321 = vmatmul.mubr.msk.bf16.vlgmr.msra.gmra.mxu0 %vm239_vm1, %v421_v14 }
  0x58   : > { %1338 = vmatmul.mubr.msk.bf16.vlgmr.msra.gmra.mxu1 %vm239_vm1, %v554_v15  ;;  %748 = vmatpush1.bf16.msra.mxu0 %v738_v17 }
  0x59   : > { %872 = vmatpush1.bf16.msra.mxu1 %v862_v18  ;;  %749 = vmatprep.subr.bf16.mxu0 %v1527_v16 }
  0x5a   : > { %873 = vmatprep.subr.bf16.mxu1 %v1530_v19  ;;  %775 = vmatprep.mubr.bf16.mxu0 %v1670_v0 }
  0x5b   : > { %899 = vmatprep.mubr.bf16.mxu1 %v1670_v0 }
  0x5c   : > { %750 = vmatpush1.bf16.msra.mxu0 %v1525_v20 }
  0x5d   : > { %874 = vmatpush1.bf16.msra.mxu1 %v1528_v21  ;;  %751 = vmatprep.subr.bf16.mxu0 %v1533_v22 }
  0x5e   : > { %875 = vmatprep.subr.bf16.mxu1 %v1536_v23 }
  0x60   : > { %752 = vmatpush1.bf16.msra.mxu0 %v1531_v24 }
  0x61   : > { %876 = vmatpush1.bf16.msra.mxu1 %v1534_v25  ;;  %753 = vmatprep.subr.bf16.mxu0 %v1539_v26 }
  0x62   : > { %877 = vmatprep.subr.bf16.mxu1 %v1542_v27 }
  0x64   : > { %754 = vmatpush1.bf16.msra.mxu0 %v1537_v28 }
  0x65   : > { %878 = vmatpush1.bf16.msra.mxu1 %v1540_v29  ;;  %755 = vmatprep.subr.bf16.mxu0 %v1545_v30 }
  0x66   : > { %879 = vmatprep.subr.bf16.mxu1 %v1548_v31 }
  0x68   : > { %756 = vmatpush1.bf16.msra.mxu0 %v1543_v32 }
  0x69   : > { %880 = vmatpush1.bf16.msra.mxu1 %v1546_v33  ;;  %757 = vmatprep.subr.bf16.mxu0 %v1551_v36 }
  0x6a   : > { %881 = vmatprep.subr.bf16.mxu1 %v1554_v37 }
  0x6c   : > { %758 = vmatpush1.bf16.msra.mxu0 %v1549_v41 }
  0x6d   : > { %882 = vmatpush1.bf16.msra.mxu1 %v1552_v42  ;;  %1383 = vmatprep.subr.msk.bf16.mxu0 %vm243_vm0, %v1382_v43 }
  0x6f   : > { %1353 = vmatmul.mubr.msk.bf16.vlgmr.msra.gmra.mxu0 %vm239_vm1, %v678_v45 }
  0x70   : > { %1369 = vmatmul.mubr.msk.bf16.vlgmr.msra.gmra.mxu1 %vm239_vm1, %v802_v46  ;;  %1003 = vmatpush1.bf16.msra.mxu0 %v993_v47 }
  0x71   : > { %1030 = vmatprep.mubr.bf16.mxu0 %v1670_v0  ;;  %1004 = vmatprep.subr.bf16.mxu0 %v1562_v48  ;;  %v932_v0 = vrot.slane %v930_v58, 2 }
  0x73   : > { %v933_v63 = vor.u32 %v932_v0, %v929_v61 }
  0x74   : > { %1005 = vmatpush1.bf16.msra.mxu0 %v1560_v49 }
  0x75   : > { %1006 = vmatprep.subr.bf16.mxu0 %v1565_v50 }
  0x78   : > { %1007 = vmatpush1.bf16.msra.mxu0 %v1563_v52 }
  0x79   : > { %1008 = vmatprep.subr.bf16.mxu0 %v1568_v53 }
  0x7c   : > { %1009 = vmatpush1.bf16.msra.mxu0 %v1566_v55  ;;  %v1674_v55 = vmov 1983009808  }
  0x7d   : > { %1010 = vmatprep.subr.bf16.mxu0 %v1571_v56  ;;  %v1085_v56 = vunpack.c.l.s4 %v1674_v55 }
  0x7f   : > { %v1086_v58 = vunpack.c.0.s8 %v1085_v56 }
  0x80   : > { %1011 = vmatpush1.bf16.msra.mxu0 %v1569_v59  ;;  %v1088_v59 = vshrl.u32 %v1087_v57, 7 }
  0x81   : > { %1012 = vmatprep.subr.bf16.mxu0 %v1574_v60 }
  0x84   : > { %1013 = vmatpush1.bf16.msra.mxu0 %v1572_v62  ;;  %v1089_v62 = vsub.s32 %v1086_v58, %v1088_v59 }
  0x87   : > { %1384 = vmatmul.mubr.msk.bf16.vlgmr.msra.gmra.mxu0 %vm239_vm1, %v933_v63 }
  0xff   : > { %v284_v1 = vpop.f32.mrf.mxu0 }
 0x100   : > { %v389_v2 = vpop.f32.mrf.mxu1 }
 0x101   : > { %v286_v3 = vpop.f32.mrf.mxu0  ;;  %v390_v26 = vadd.f32 %v389_v2, %v284_v1 }
 0x102   : > { %v391_v4 = vpop.f32.mrf.mxu1 }
 0x103   : > { %v392_v5 = vadd.f32 %v391_v4, %v286_v3  ;;  %v288_v6 = vpop.f32.mrf.mxu0  ;;  %v1106_v3 = vsub.s32 1, %v1088_v59 }
 0x104   : > { %v393_v7 = vpop.f32.mrf.mxu1 }
 0x105   : > { %v289_v8 = vpop.f32.mrf.mxu0 }
 0x106   : > { %v394_v9 = vpop.f32.mrf.mxu1 }
 0x117   : > { %v520_v10 = vpop.f32.mrf.mxu0 }
 0x118   : > { %v653_v11 = vpop.f32.mrf.mxu1  ;;  %v527_v27 = vadd.f32 %v520_v10, %v390_v26 }
 0x119   : > { %v522_v12 = vpop.f32.mrf.mxu0 }
 0x11a   : > { %v655_v13 = vpop.f32.mrf.mxu1  ;;  %v528_v28 = vadd.f32 %v522_v12, %v392_v5  ;;  %v660_v29 = vadd.f32 %v653_v11, %v527_v27 }
 0x11b   : > { %v524_v14 = vpop.f32.mrf.mxu0 }
 0x11c   : > { %v657_v15 = vpop.f32.mrf.mxu1  ;;  %v661_v30 = vadd.f32 %v655_v13, %v528_v28 }
 0x11d   : > { %v525_v16 = vpop.f32.mrf.mxu0 }
 0x11e   : > { %v658_v17 = vpop.f32.mrf.mxu1 }
 0x12f   : > { %v777_v18 = vpop.f32.mrf.mxu0 }
 0x130   : > { %v901_v19 = vpop.f32.mrf.mxu1  ;;  %v784_v31 = vadd.f32 %v777_v18, %v660_v29 }
 0x131   : > { %v779_v20 = vpop.f32.mrf.mxu0 }
 0x132   : > { %v903_v21 = vpop.f32.mrf.mxu1  ;;  %v785_v32 = vadd.f32 %v779_v20, %v661_v30  ;;  %v908_v33 = vadd.f32 %v901_v19, %v784_v31 }
 0x133   : > { %v781_v22 = vpop.f32.mrf.mxu0 }
 0x134   : > { %v905_v23 = vpop.f32.mrf.mxu1  ;;  %v909_v35 = vadd.f32 %v903_v21, %v785_v32  ;;  %v1164_v21 = vsub.s32 0, %v1088_v59 }
 0x135   : > { %v782_v24 = vpop.f32.mrf.mxu0 }
 0x136   : > { %v906_v25 = vpop.f32.mrf.mxu1 }
 0x147   : > { %v1032_v34 = vpop.f32.mrf.mxu0 }
 0x148   : > { %v1039_v36 = vadd.f32 %v1032_v34, %v908_v33 }
 0x149   : > { %v1034_v37 = vpop.f32.mrf.mxu0 }
 0x14a   : > { %v1041_v38 = vmax.f32 %v1039_v36, 0.0  ;;  %v1040_v39 = vadd.f32 %v1034_v37, %v909_v35 }
 0x14b   : > { %v1036_v40 = vpop.f32.mrf.mxu0 }
 0x14c   : > { %1054 = vrot.lane.b32.xlu1 %v1041_v38, %s1671_s6  ;;  %1045 = vrot.lane.b32.xlu0 %v1041_v38, %s1672_s7  ;;  %v1042_v42 = vmax.f32 %v1040_v39, 0.0 }
 0x14d   : > { %v1037_v41 = vpop.f32.mrf.mxu0 }
 0x150   : > { %1056 = vrot.lane.b32.xlu1 %v1042_v42, %s1671_s6  ;;  %1047 = vrot.lane.b32.xlu0 %v1042_v42, %s1672_s7 }
 0x1be   : > { %v1055_v43 = vpop.permute.xlu1 %1054  ;;  %v1046_v44 = vpop.permute.xlu0 %1045 }
 0x1bf   : > { %v1053_v45 = vsel %vm1049_vm2, 0.0, %v1046_v44 }
 0x1c0   : > { %v1063_v46 = vmax.f32 %v1041_v38, %v1053_v45 }
 0x1c2   : > { %v1057_v47 = vpop.permute.xlu1 %1056  ;;  %v1048_v48 = vpop.permute.xlu0 %1047 }
 0x1c3   : > { %v1059_v49 = vsel %vm1058_vm3, %v1055_v43, %v1057_v47  ;;  %v1050_v50 = vsel %vm1049_vm2, %v1046_v44, %v1048_v48  ;;  %v1062_v53 = vsel %vm1058_vm3, %v1057_v47, 0.0 }
 0x1c4   : > { %v1065_v51 = vmax.f32 %v1063_v46, %v1059_v49  ;;  %v1064_v52 = vmax.f32 %v1042_v42, %v1050_v50 }
 0x1c6   : > { %1068 = vrot.lane.b32.xlu0 %v1065_v51, %s1671_s6  ;;  %v1066_v54 = vmax.f32 %v1064_v52, %v1062_v53 }
 0x1c8   : > { %1072 = vrot.lane.b32.xlu1 %v1066_v54, %s1673_s8 }
 0x1ca   : > { %1075 = vrot.lane.b32.xlu0 %v1066_v54, %s1672_s7 }
 0x238   : > { %v1069_v60 = vpop.permute.xlu0 %1068 }
 0x239   : > { %v1078_v61 = vsel %vm1049_vm2, %v1065_v51, %v1069_v60 }
 0x23a   : > { %v1073_v0 = vpop.permute.xlu1 %1072 }
 0x23b   : > { %v1080_v63 = vsel %vm1079_vm4, %v1078_v61, %v1073_v0 }
 0x23c   : > { %v1076_v1 = vpop.permute.xlu0 %1075 }
 0x23d   : > { %v1081_v2 = vsel %vm1058_vm3, %v1080_v63, %v1076_v1 }
 0x23e   : > { %v1083_v4 = vcombine.high %v1081_v2, %v1081_v2  ;;  %v1090_v5 = vrot.slane %v1081_v2, %v1089_v62 }
 0x240   : > { %v1097_v6 = vrot.slane %v1083_v4, %v1089_v62  ;;  %v1098_v7 = vcombine.high %v1090_v5, %v1090_v5  ;;  %v1107_v8 = vrot.slane %v1090_v5, %v1106_v3  ;;  %v1385_v12 = vrot.slane %v1090_v5, 9 }
 0x242   : > { %v1111_v9 = vrot.slane %v1098_v7, %v1106_v3  ;;  %v1115_v10 = vrot.slane %v1097_v6, %v1106_v3  ;;  %v1099_v11 = vcombine.high %v1097_v6, %v1097_v6  ;;  %v1386_v13 = vrot.slane %v1098_v7, 9 }
 0x243   : > { %v1387_v15 = vrot.slane %v1097_v6, 9  ;;  %v1135_v19 = vmax.f32 %v1090_v5, %v1385_v12 }
 0x244   : > { %v1117_v14 = vsel %vm1116_vm5, %v1111_v9, %v1107_v8  ;;  %v1388_v18 = vrot.slane %v1099_v11, 9  ;;  %v1136_v22 = vmax.f32 %v1098_v7, %v1386_v13 }
 0x245   : > { %v1119_v16 = vsel %vm1118_vm6, %v1115_v10, %v1117_v14  ;;  %v1137_v23 = vmax.f32 %v1097_v6, %v1387_v15 }
 0x246   : > { %v1122_v17 = vsel %vm1121_vm7, 0.0, %v1119_v16  ;;  %v1138_v27 = vmax.f32 %v1099_v11, %v1388_v18 }
 0x247   : > { %v1146_v20 = vrot.slane %v1122_v17, %v1089_v62 }
 0x249   : > { %v1147_v24 = vcombine.high %v1146_v20, %v1146_v20  ;;  %v1148_v25 = vrot.slane %v1146_v20, 1  ;;  %v1154_v26 = vmax.f32 %v1135_v19, %v1146_v20 }
 0x24b   : > { %v1149_v28 = vrot.slane %v1147_v24, 1  ;;  %v1155_v29 = vmax.f32 %v1136_v22, %v1148_v25  ;;  %v1156_v30 = vmax.f32 %v1137_v23, %v1147_v24  ;;  %v1165_v32 = vrot.slane %v1154_v26, %v1164_v21 }
 0x24d   : > { %v1157_v31 = vmax.f32 %v1138_v27, %v1149_v28  ;;  %v1169_v33 = vrot.slane %v1155_v29, %v1164_v21  ;;  %v1173_v34 = vrot.slane %v1156_v30, %v1164_v21 }
 0x24f   : > { %v1177_v35 = vrot.slane %v1157_v31, %v1164_v21  ;;  %v1179_v36 = vsel %vm1178_vm8, %v1169_v33, %v1165_v32 }
 0x250   : > { %v1180_v37 = vsel %vm1116_vm5, %v1173_v34, %v1179_v36 }
 0x251   : > { %v1181_v38 = vsel %vm1118_vm6, %v1177_v35, %v1180_v37 }
 0x252   : > { %1183 = vst [vmem:[%s151_s21] sm:$0xf] %v1181_v38 }
 0x253   : > { %1614 = shalt.err (!%p1611_p0)
}
 0x254   : > { %s1615_s30 = scalar_lea.hbm %s1825_s25, 64  ;;  %s1619_s5 = scalar_lea.hbm %s1865_s2, 128 }
 0x255   : > { %p1616_p1 = scmp.ne.s32.totalorder %s1825_s25, %s1615_s30  ;;  %p1620_p4 = scmp.lt.s32.totalorder %s1825_s25, %s1865_s2 }
 0x256   : > { %p1621_p7 = scmp.lt.s32.totalorder %s1619_s5, %s1615_s30 }
 0x257   : > { %p1617_p2 = pnand %p1616_p1, %p1729_p5 }
 0x258   : > { %p1622_p6 = por %p1621_p7, %p1620_p4 }
 0x259   : > { %p1618_p3 = pneg %p1617_p2 }
 0x25b   : > { %p1623_p8 = pnand %p1622_p6, %p1618_p3 }
 0x25d   : > { %1626 = shalt.err (!%p1623_p8)
}
 0x25e   : > { %1398 = dma.vmem_to_hbm [thread:$0]  (%p1729_p5), %s1199_s22, 64, %s1825_s25, %s1185_s26  }
 0x25f PF: > { %p1410_p9 = scmp.ge.s32.totalorder %s1665_s12, 2  ;;  %s1210_s8 = sand.u32 1, %s1653_s9  }
 0x260   : > { %p1869_p10 = scmp.ne.s32.totalorder %s1867_s20, 0  ;;  %s1211_s14 = scalar_lea.sflag [#allocation4], %s1210_s8 }
 0x262   : > { %p1405_p11 = pnand %p1410_p9, %p1869_p10 }
 0x264   : > { %p1406_p12 = pneg %p1405_p11 }
 0x266   : > { %1648 = dma.done.wait (%p1406_p12), %s1211_s14, 64  }
 0x267   : > { %1650 = vsyncadd (%p1406_p12), %s1211_s14, 4294967232  ;;  %p13_p13 = scmp.ge.s32.totalorder %s1716_s15, 4   ;;  %s1870_s9 = smov %s1657_s10 }
 0x268   : > { %s1871_s10 = smov %s1661_s11  ;;  %s1872_s11 = smov %s1727_s18 }
 0x269   : > { %s1873_s12 = smov %s1716_s15  ;;  %15 = sbr.rel (!%p13_p13) target bundleno = 4 (0x4), region = 75 }
 0x26e   :  { %1216 = vsyncpa [#allocation3], 1 }
 0x26f   :  { %1218 = vsyncpa [#allocation3 + $0x1], 1 }
 0x270   :  { %1219 = vsyncpa [#allocation4], 1 }
 0x271   :  { %1221 = vsyncpa [#allocation4 + $0x1], 1 }

</bundles_post_ra>
